<compile_context>
chip_gen: v7x
topology: tpu7x:2x2x1
jax: 0.10.0
libtpu: 0.0.40
codegen_flags: <defaults>
</compile_context>

<pallas_src>
import jax
import jax.numpy as jnp
from jax import lax
from jax.experimental import pallas as pl
from jax.experimental.pallas import tpu as pltpu


def _round_up(x, m):
    return ((x + m - 1) // m) * m


def _pick_tile(size, align, max_tile):
    """Largest tile <= max_tile (multiple of `align`) keeping pad waste small.

    Returns (tile, padded_size) with tile | padded_size and padded_size >= size.
    """
    padded = _round_up(max(size, align), align)
    if padded <= max_tile:
        return padded, padded
    for t in range(max_tile, align - 1, -align):
        p = _round_up(padded, t)
        if p - padded <= max(padded // 8, align):   # <= ~12.5% overshoot
            return t, p
    return align, padded   # unreachable (t == align gives zero waste)


# Per-buffer budget for keeping the full-K weight tile resident in VMEM.
_WEIGHT_RESIDENT_BYTES = 4 * 1024 * 1024


def _linear_kernel(x_ref, w_ref, b_ref, o_ref):
    # x_ref: (tm, tk)  w_ref: (tn, tk)  b_ref: (1, tn)  o_ref: (tm, tn) f32
    # The output block is resident across the K grid axis (index_map (i, j)),
    # so it doubles as the f32 accumulator: init with bias, then accumulate.
    @pl.when(pl.program_id(2) == 0)
    def _():
        o_ref[...] = jnp.broadcast_to(b_ref[...], o_ref.shape).astype(o_ref.dtype)

    # Contract feat_dim (dim 1 of x, dim 1 of w) -> (tm, tn) on the MXU.
    o_ref[...] += lax.dot_general(
        x_ref[...], w_ref[...],
        dimension_numbers=(((1,), (1,)), ((), ())),
        preferred_element_type=jnp.float32)


def plan_linear_classifier(feat_dim, n_label, w_dtype=jnp.float32):
    """Static tiling plan (depends only on the layer's shape/dtype)."""
    w_bytes = jnp.dtype(w_dtype).itemsize
    tn, Np = _pick_tile(n_label, 128, 512)          # lane-dense label tile
    K128 = _round_up(feat_dim, 128)
    if tn * K128 * w_bytes <= _WEIGHT_RESIDENT_BYTES:
        tk, Kp = K128, K128                          # full K: weight fetched once
    else:
        tk, Kp = _pick_tile(K128, 128, 2048)         # K-tiled fallback
    return dict(feat_dim=feat_dim, n_label=n_label, tn=tn, Np=Np, tk=tk, Kp=Kp)


def prepare_params(weight, bias, plan):
    """Pad Linear parameters once (hoisted out of the per-call path)."""
    n_label, feat_dim = weight.shape
    Np, Kp = plan["Np"], plan["Kp"]
    w_p = weight
    if (Np, Kp) != (n_label, feat_dim):
        w_p = jnp.pad(weight, ((0, Np - n_label), (0, Kp - feat_dim)))
    b_p = jnp.pad(bias.astype(jnp.float32), (0, Np - n_label)).reshape(1, Np)
    return w_p, b_p


def linear_classifier_forward(x_nchw, w_padded, b_padded, plan):
    """Forward pass: Flatten -> x @ W.T + b.  Returns (B, n_label) float32."""
    B = x_nchw.shape[0]
    x2d = x_nchw.reshape(B, -1)                      # Flatten (native dtype)
    feat_dim = x2d.shape[1]
    assert feat_dim == plan["feat_dim"]

    tn, Np, tk, Kp = plan["tn"], plan["Np"], plan["tk"], plan["Kp"]
    n_label = plan["n_label"]

    # Batch tiling: sublane-aligned, up to 512 rows, minimal pad waste.
    sub = 8 if jnp.dtype(x2d.dtype).itemsize == 4 else 16
    tm, Bp = _pick_tile(B, sub, 512)
    # v7x megacore: prefer >=2 parallel grid steps when the split is free.
    if Bp == tm and Np == tn and tm % (2 * sub) == 0:
        tm //= 2

    x_p = x2d
    if (Bp, Kp) != (B, feat_dim):
        x_p = jnp.pad(x2d, ((0, Bp - B), (0, Kp - feat_dim)))

    grid = (Bp // tm, Np // tn, Kp // tk)

    out = pl.pallas_call(
        _linear_kernel,
        out_shape=jax.ShapeDtypeStruct((Bp, Np), jnp.float32),
        grid_spec=pltpu.PrefetchScalarGridSpec(
            num_scalar_prefetch=0,
            grid=grid,
            in_specs=[
                pl.BlockSpec((tm, tk), lambda i, j, k: (i, k)),   # x tile
                pl.BlockSpec((tn, tk), lambda i, j, k: (j, k)),   # weight tile
                pl.BlockSpec((1, tn), lambda i, j, k: (0, j)),    # bias tile
            ],
            out_specs=pl.BlockSpec((tm, tn), lambda i, j, k: (i, j)),
        ),
        compiler_params=pltpu.CompilerParams(
            dimension_semantics=("parallel", "parallel", "arbitrary"),
            vmem_limit_bytes=32 * 1024 * 1024),
    )(x_p, w_padded, b_padded)

    # Slice away the lane/sublane padding.
    return out[:B, :n_label]


if __name__ == "__main__":
    key = jax.random.PRNGKey(0)
    k_x, k_w = jax.random.split(key)

    # Small shapes consistent with the module: x (2, 4, 16, 16) -> feat_dim=1024
    B, C, H, W = 2, 4, 16, 16
    feat_dim = C * H * W
    n_label = 10

    x = jax.random.normal(k_x, (B, C, H, W), dtype=jnp.float32)

    # Deterministic params matching LinearClassifier.initilize():
    # weight ~ N(0, 0.01), bias = 0
    weight = 0.01 * jax.random.normal(k_w, (n_label, feat_dim), dtype=jnp.float32)
    bias = jnp.zeros((n_label,), dtype=jnp.float32)

    # Parameter padding is done once, outside the per-call path.
    plan = plan_linear_classifier(feat_dim, n_label, weight.dtype)
    w_p, b_p = prepare_params(weight, bias, plan)

    y = linear_classifier_forward(x, w_p, b_p, plan)
    y = jax.block_until_ready(y)

    # Sanity check against plain-JAX reference.
    y_ref = x.reshape(B, feat_dim) @ weight.T + bias
    assert y.shape == (B, n_label)
    assert jnp.allclose(y, y_ref, atol=1e-5, rtol=1e-5)

    print("KERNEL_OK")
</pallas_src>

<mosaic_0001>
module attributes {stable_mosaic.version = 11 : i64} {
  func.func @_linear_kernel(%arg0: i32, %arg1: i32, %arg2: i32, %arg3: memref<8x1024xf32, #tpu.memory_space<vmem>>, %arg4: memref<128x1024xf32, #tpu.memory_space<vmem>>, %arg5: memref<1x128xf32, #tpu.memory_space<vmem>>, %arg6: memref<8x128xf32, #tpu.memory_space<vmem>>) attributes {dimension_semantics = [#tpu.dimension_semantics<parallel>, #tpu.dimension_semantics<parallel>, #tpu.dimension_semantics<arbitrary>], iteration_bounds = array<i64: 1, 1, 1>, scalar_prefetch = 0 : i64, scratch_operands = 0 : i64, tpu.core_type = #tpu.core_type<tc>, window_params = [{transform_indices = @transform_0, window_bounds = array<i64: 8, 1024>}, {transform_indices = @transform_1, window_bounds = array<i64: 128, 1024>}, {transform_indices = @transform_2, window_bounds = array<i64: 1, 128>}, {transform_indices = @transform_3, window_bounds = array<i64: 8, 128>}]} {
    %c0_i32 = arith.constant 0 : i32
    %0 = arith.cmpi eq, %arg2, %c0_i32 : i32
    %1 = arith.extui %0 : i1 to i32
    %c0_i32_0 = arith.constant 0 : i32
    %2 = arith.cmpi ne, %1, %c0_i32_0 : i32
    scf.if %2 {
      %c0_8 = arith.constant 0 : index
      %c0_9 = arith.constant 0 : index
      %9 = vector.load %arg5[%c0_8, %c0_9] : memref<1x128xf32, #tpu.memory_space<vmem>>, vector<1x128xf32>
      %10 = vector.shape_cast %9 : vector<1x128xf32> to vector<1x128xf32>
      %11 = vector.broadcast %10 : vector<1x128xf32> to vector<8x128xf32>
      %c0_10 = arith.constant 0 : index
      %c0_11 = arith.constant 0 : index
      %12 = vector.load %arg6[%c0_10, %c0_11] : memref<8x128xf32, #tpu.memory_space<vmem>>, vector<8x128xf32>
      tpu.vector_store %arg6[%c0_10, %c0_11], %11 {strides = array<i32>} : memref<8x128xf32, #tpu.memory_space<vmem>>, vector<8x128xf32>,
    } else {
    }
    %c0 = arith.constant 0 : index
    %c0_1 = arith.constant 0 : index
    %3 = vector.load %arg6[%c0, %c0_1] : memref<8x128xf32, #tpu.memory_space<vmem>>, vector<8x128xf32>
    %c0_2 = arith.constant 0 : index
    %c0_3 = arith.constant 0 : index
    %4 = vector.load %arg3[%c0_2, %c0_3] : memref<8x1024xf32, #tpu.memory_space<vmem>>, vector<8x1024xf32>
    %c0_4 = arith.constant 0 : index
    %c0_5 = arith.constant 0 : index
    %5 = vector.load %arg4[%c0_4, %c0_5] : memref<128x1024xf32, #tpu.memory_space<vmem>>, vector<128x1024xf32>
    %cst = arith.constant dense<0.000000e+00> : vector<8x128xf32>
    %6 = tpu.matmul %4, %5, %cst {dimension_numbers = #tpu.dot_dimension_numbers<[1], [1], [0], [0], [0, 0, 1, 0], [], []>} : vector<8x1024xf32>, vector<128x1024xf32>, vector<8x128xf32> -> vector<8x128xf32>
    %7 = arith.addf %3, %6 : vector<8x128xf32>
    %c0_6 = arith.constant 0 : index
    %c0_7 = arith.constant 0 : index
    %8 = vector.load %arg6[%c0_6, %c0_7] : memref<8x128xf32, #tpu.memory_space<vmem>>, vector<8x128xf32>
    tpu.vector_store %arg6[%c0_6, %c0_7], %7 {strides = array<i32>} : memref<8x128xf32, #tpu.memory_space<vmem>>, vector<8x128xf32>,
    return
  }
  func.func @transform_0(%arg0: i32, %arg1: i32, %arg2: i32) -> (i32, i32) {
    %c0_i32 = arith.constant 0 : i32
    return %arg0, %arg2 : i32, i32
  }
  func.func @transform_1(%arg0: i32, %arg1: i32, %arg2: i32) -> (i32, i32) {
    %c0_i32 = arith.constant 0 : i32
    return %arg1, %arg2 : i32, i32
  }
  func.func @transform_2(%arg0: i32, %arg1: i32, %arg2: i32) -> (i32, i32) {
    %c0_i32 = arith.constant 0 : i32
    %c0_i32_0 = arith.constant 0 : i32
    return %c0_i32, %arg1 : i32, i32
  }
  func.func @transform_3(%arg0: i32, %arg1: i32, %arg2: i32) -> (i32, i32) {
    %c0_i32 = arith.constant 0 : i32
    return %arg0, %arg1 : i32, i32
  }
}

</mosaic_0001>

<bundles_post_ra>
// kernel: tpu_custom_call.1
= control target key start
LH: loop header
LB: loop body
LE: loop exit
PB: predicated region body
PF: predicated region fallthrough
CT: control target
= control target key end

     0   :  { %8 = vsyncpa [#allocation3], 0  ;;  %s765_s0 = inlined_call_operand.hbm [shape: f32[8,1024], index: 0, kind: input, shape index: {}]   ;;  %s766_s1 = inlined_call_operand.hbm [shape: f32[128,1024], index: 1, kind: input, shape index: {}]   ;;  %s767_s2 = inlined_call_operand.vmem [shape: f32[1,128], index: 2, kind: input, shape index: {}]   ;;  %s768_s3 = inlined_call_operand.hbm [shape: f32[8,128], index: 3, kind: output, shape index: {}]  }
   0x1   :  { %9 = vsyncpa [#allocation6], 0 }
   0x2   :  { %10 = vsyncpa [#allocation4], 0  ;;  %s694_s12 = smov [#allocation2]   ;;  %s695_s14 = smov [#allocation5]  }
   0x3   :  { %s17_s13 = sshll.u32 %s694_s12, 4  ;;  %s26_s15 = sshll.u32 %s695_s14, 4  ;;  %s18_s13 = int_to_ptr.vmem [resolvable:$true] %s17_s13  ;;  %s719_s15 = int_to_ptr.vmem [resolvable:$true] %s26_s15 }
   0x4   :  { %s622_s18 = scalar_lea.hbm %s765_s0, 1024 }
   0x5   :  { %p623_p0 = scmp.ne.s32.totalorder %s765_s0, %s622_s18  ;;  %p626_p1 = scmp.lt.u32.totalorder %s622_s18, %s765_s0 }
   0x7   :  { %p628_p2 = pnand %p626_p1, %p623_p0 }
   0x9   :  { %631 = shalt.err (!%p628_p2)
}
   0xa   :  { %s632_s23 = scalar_lea.vmem %s18_s13, 1024  ;;  %p637_p4 = scmp.lt.s32.totalorder %s18_s13, %s18_s13 }
   0xb   :  { %p633_p3 = scmp.ne.s32.totalorder %s18_s13, %s632_s23  ;;  %p638_p5 = scmp.lt.s32.totalorder %s632_s23, %s632_s23 }
   0xd   :  { %p639_p6 = por %p638_p5, %p637_p4 }
   0xf   :  { %p640_p7 = pnand %p639_p6, %p633_p3 }
  0x11   :  { %643 = shalt.err (!%p640_p7)
}
  0x12   :  { %20 = dma.hbm_to_vmem [thread:$0]  %s765_s0, 1024, %s18_s13, [#allocation3]  }
  0x13   :  { %s644_s28 = scalar_lea.hbm %s766_s1, 16384 }
  0x14   :  { %p645_p8 = scmp.ne.s32.totalorder %s766_s1, %s644_s28  ;;  %p648_p9 = scmp.lt.u32.totalorder %s644_s28, %s766_s1 }
  0x16   :  { %p650_p10 = pnand %p648_p9, %p645_p8 }
  0x18   :  { %653 = shalt.err (!%p650_p10)
}
  0x19   :  { %s654_s6 = scalar_lea.vmem %s719_s15, 16384  ;;  %p659_p12 = scmp.lt.s32.totalorder %s719_s15, %s719_s15 }
  0x1a   :  { %p655_p11 = scmp.ne.s32.totalorder %s719_s15, %s654_s6  ;;  %p660_p13 = scmp.lt.s32.totalorder %s654_s6, %s654_s6 }
  0x1c   :  { %p661_p0 = por %p660_p13, %p659_p12 }
  0x1e   :  { %p662_p1 = pnand %p661_p0, %p655_p11 }
  0x20   :  { %665 = shalt.err (!%p662_p1)
}
  0x21   :  { %s696_s0 = smov 1024   ;;  %s697_s7 = smov 64  }
  0x22   :  { %32 = dma.hbm_to_vmem [thread:$0]  %s766_s1, 16384, %s719_s15, [#allocation6], %s696_s0, %s696_s0, %s697_s7  }
  0x23   :  { %688 = dma.done.wait [#allocation3], 1024  }
  0x24   :  { %689 = vsyncadd [#allocation3], 4294966272 }
  0x25   :  { %690 = dma.done.wait [#allocation6], 16384  }
  0x26   :  { %691 = vsyncadd [#allocation6], 4294950912  ;;  %v63_v0 = vld [vmem:[#allocation5 + $0x8] sm:$0xff]  ;;  %v62_v2 = vld [vmem:[#allocation5] sm:$0xff]  ;;  %s698_s11 = smov [#allocation7]  }
  0x27   :  { %v71_v1 = vld [vmem:[#allocation5 + $0x48] sm:$0xff]  ;;  %v70_v4 = vld [vmem:[#allocation5 + $0x40] sm:$0xff]  ;;  %v65_v5 = vld [vmem:[#allocation5 + $0x18] sm:$0xff]  ;;  %s478_s12 = sshll.u32 %s698_s11, 4  ;;  %s479_s12 = int_to_ptr.vmem [resolvable:$true] %s478_s12 }
  0x28   :  { %v489_v3 = vpack.c.bf16 %v71_v1, %v63_v0  ;;  %v73_v6 = vld [vmem:[#allocation5 + $0x58] sm:$0xff]  ;;  %v491_v7 = vpack.c.bf16 %v70_v4, %v62_v2  ;;  %v64_v9 = vld [vmem:[#allocation5 + $0x10] sm:$0xff]  ;;  %v79_v11 = vld [vmem:[#allocation5 + $0x88] sm:$0xff]  ;;  %s666_s13 = scalar_lea.vmem %s479_s12, 128  ;;  %p671_p3 = scmp.lt.s32.totalorder %s479_s12, %s479_s12 }
  0x29   :  { %v521_v8 = vpack.c.bf16 %v73_v6, %v65_v5  ;;  %v72_v10 = vld [vmem:[#allocation5 + $0x50] sm:$0xff]  ;;  %v87_v13 = vld [vmem:[#allocation5 + $0xc8] sm:$0xff]  ;;  %v81_v15 = vld [vmem:[#allocation5 + $0x98] sm:$0xff]  ;;  %p667_p2 = scmp.ne.s32.totalorder %s479_s12, %s666_s13  ;;  %p672_p4 = scmp.lt.s32.totalorder %s666_s13, %s666_s13 }
  0x2a   :  { %490 = vmatprep.subr.bf16.mxu0 %v489_v3  ;;  %v523_v12 = vpack.c.bf16 %v72_v10, %v64_v9  ;;  %v493_v14 = vpack.c.bf16 %v87_v13, %v79_v11  ;;  %v89_v16 = vld [vmem:[#allocation5 + $0xd8] sm:$0xff]  ;;  %v78_v17 = vld [vmem:[#allocation5 + $0x80] sm:$0xff]  ;;  %v80_v20 = vld [vmem:[#allocation5 + $0x90] sm:$0xff] }
  0x2b   :  { %492 = vmatpush1.bf16.xpose.msra.mxu0 %v491_v7  ;;  %522 = vmatprep.subr.bf16.mxu1 %v521_v8  ;;  %v86_v18 = vld [vmem:[#allocation5 + $0xc0] sm:$0xff]  ;;  %v525_v19 = vpack.c.bf16 %v89_v16, %v81_v15  ;;  %v88_v21 = vld [vmem:[#allocation5 + $0xd0] sm:$0xff]  ;;  %v95_v22 = vld [vmem:[#allocation5 + $0x108] sm:$0xff]  ;;  %p673_p5 = por %p672_p4, %p671_p3 }
  0x2c   :  { %524 = vmatpush1.bf16.xpose.msra.mxu1 %v523_v12  ;;  %494 = vmatprep.subr.bf16.mxu0 %v493_v14  ;;  %v103_v23 = vld [vmem:[#allocation5 + $0x148] sm:$0xff]  ;;  %v97_v24 = vld [vmem:[#allocation5 + $0x118] sm:$0xff]  ;;  %v495_v26 = vpack.c.bf16 %v86_v18, %v78_v17  ;;  %v527_v27 = vpack.c.bf16 %v88_v21, %v80_v20  ;;  %v94_v30 = vld [vmem:[#allocation5 + $0x100] sm:$0xff] }
  0x2d   :  { %526 = vmatprep.subr.bf16.mxu1 %v525_v19  ;;  %v105_v25 = vld [vmem:[#allocation5 + $0x158] sm:$0xff]  ;;  %v497_v28 = vpack.c.bf16 %v103_v23, %v95_v22  ;;  %v102_v31 = vld [vmem:[#allocation5 + $0x140] sm:$0xff]  ;;  %v96_v32 = vld [vmem:[#allocation5 + $0x110] sm:$0xff]  ;;  %p674_p6 = pnand %p673_p5, %p667_p2 }
  0x2e   :  { %v529_v29 = vpack.c.bf16 %v105_v25, %v97_v24  ;;  %v104_v33 = vld [vmem:[#allocation5 + $0x150] sm:$0xff]  ;;  %v111_v34 = vld [vmem:[#allocation5 + $0x188] sm:$0xff]  ;;  %v113_v36 = vld [vmem:[#allocation5 + $0x198] sm:$0xff]  ;;  %v499_v38 = vpack.c.bf16 %v102_v31, %v94_v30 }
  0x2f   :  { %v119_v35 = vld [vmem:[#allocation5 + $0x1c8] sm:$0xff]  ;;  %v121_v37 = vld [vmem:[#allocation5 + $0x1d8] sm:$0xff]  ;;  %v531_v39 = vpack.c.bf16 %v104_v33, %v96_v32  ;;  %v110_v42 = vld [vmem:[#allocation5 + $0x180] sm:$0xff] }
  0x30   :  { %v501_v40 = vpack.c.bf16 %v119_v35, %v111_v34  ;;  %v533_v41 = vpack.c.bf16 %v121_v37, %v113_v36  ;;  %v118_v43 = vld [vmem:[#allocation5 + $0x1c0] sm:$0xff]  ;;  %v112_v44 = vld [vmem:[#allocation5 + $0x190] sm:$0xff]  ;;  %v55_v46 = vld [vmem:[#allocation2 + $0x8] sm:$0xff] }
  0x31   :  { %v120_v45 = vld [vmem:[#allocation5 + $0x1d0] sm:$0xff]  ;;  %v127_v47 = vld [vmem:[#allocation5 + $0x208] sm:$0xff]  ;;  %254 = vmatprep.mubr.f32.mxu0 %v55_v46  ;;  %v57_v49 = vld [vmem:[#allocation2 + $0x18] sm:$0xff]  ;;  %v503_v52 = vpack.c.bf16 %v118_v43, %v110_v42 }
  0x32   :  { %v135_v48 = vld [vmem:[#allocation5 + $0x248] sm:$0xff]  ;;  %v129_v50 = vld [vmem:[#allocation5 + $0x218] sm:$0xff]  ;;  %324 = vmatprep.mubr.f32.mxu1 %v57_v49  ;;  %v535_v53 = vpack.c.bf16 %v120_v45, %v112_v44  ;;  %v126_v56 = vld [vmem:[#allocation5 + $0x200] sm:$0xff] }
  0x33   :  { %496 = vmatpush1.bf16.xpose.msra.mxu0 %v495_v26  ;;  %v137_v51 = vld [vmem:[#allocation5 + $0x258] sm:$0xff]  ;;  %v505_v54 = vpack.c.bf16 %v135_v48, %v127_v47  ;;  %v134_v57 = vld [vmem:[#allocation5 + $0x240] sm:$0xff]  ;;  %v128_v58 = vld [vmem:[#allocation5 + $0x210] sm:$0xff] }
  0x34   :  { %528 = vmatpush1.bf16.xpose.msra.mxu1 %v527_v27  ;;  %498 = vmatprep.subr.bf16.mxu0 %v497_v28  ;;  %v537_v55 = vpack.c.bf16 %v137_v51, %v129_v50  ;;  %v136_v59 = vld [vmem:[#allocation5 + $0x250] sm:$0xff]  ;;  %v143_v60 = vld [vmem:[#allocation5 + $0x288] sm:$0xff]  ;;  %v145_v62 = vld [vmem:[#allocation5 + $0x298] sm:$0xff]  ;;  %v507_v0 = vpack.c.bf16 %v134_v57, %v126_v56 }
  0x35   :  { %530 = vmatprep.subr.bf16.mxu1 %v529_v29  ;;  %v151_v61 = vld [vmem:[#allocation5 + $0x2c8] sm:$0xff]  ;;  %v153_v63 = vld [vmem:[#allocation5 + $0x2d8] sm:$0xff]  ;;  %v539_v1 = vpack.c.bf16 %v136_v59, %v128_v58  ;;  %v142_v4 = vld [vmem:[#allocation5 + $0x280] sm:$0xff] }
  0x36   :  { %v509_v2 = vpack.c.bf16 %v151_v61, %v143_v60  ;;  %v541_v3 = vpack.c.bf16 %v153_v63, %v145_v62  ;;  %v150_v5 = vld [vmem:[#allocation5 + $0x2c0] sm:$0xff]  ;;  %v144_v6 = vld [vmem:[#allocation5 + $0x290] sm:$0xff]  ;;  %v159_v8 = vld [vmem:[#allocation5 + $0x308] sm:$0xff] }
  0x37   :  { %v152_v7 = vld [vmem:[#allocation5 + $0x2d0] sm:$0xff]  ;;  %v167_v9 = vld [vmem:[#allocation5 + $0x348] sm:$0xff]  ;;  %v161_v10 = vld [vmem:[#allocation5 + $0x318] sm:$0xff]  ;;  %v511_v12 = vpack.c.bf16 %v150_v5, %v142_v4 }
  0x38   :  { %v169_v11 = vld [vmem:[#allocation5 + $0x358] sm:$0xff]  ;;  %v543_v13 = vpack.c.bf16 %v152_v7, %v144_v6  ;;  %v513_v14 = vpack.c.bf16 %v167_v9, %v159_v8  ;;  %v158_v16 = vld [vmem:[#allocation5 + $0x300] sm:$0xff]  ;;  %v160_v18 = vld [vmem:[#allocation5 + $0x310] sm:$0xff] }
  0x39   :  { %v545_v15 = vpack.c.bf16 %v169_v11, %v161_v10  ;;  %v166_v17 = vld [vmem:[#allocation5 + $0x340] sm:$0xff]  ;;  %v168_v19 = vld [vmem:[#allocation5 + $0x350] sm:$0xff]  ;;  %v175_v20 = vld [vmem:[#allocation5 + $0x388] sm:$0xff] }
  0x3a   :  { %v183_v21 = vld [vmem:[#allocation5 + $0x3c8] sm:$0xff]  ;;  %v177_v22 = vld [vmem:[#allocation5 + $0x398] sm:$0xff]  ;;  %v515_v24 = vpack.c.bf16 %v166_v17, %v158_v16  ;;  %v547_v25 = vpack.c.bf16 %v168_v19, %v160_v18  ;;  %v174_v28 = vld [vmem:[#allocation5 + $0x380] sm:$0xff] }
  0x3b   :  { %500 = vmatpush1.bf16.xpose.msra.mxu0 %v499_v38  ;;  %v185_v23 = vld [vmem:[#allocation5 + $0x3d8] sm:$0xff]  ;;  %v517_v26 = vpack.c.bf16 %v183_v21, %v175_v20  ;;  %v182_v29 = vld [vmem:[#allocation5 + $0x3c0] sm:$0xff]  ;;  %v176_v30 = vld [vmem:[#allocation5 + $0x390] sm:$0xff] }
  0x3c   :  { %532 = vmatpush1.bf16.xpose.msra.mxu1 %v531_v39  ;;  %502 = vmatprep.subr.bf16.mxu0 %v501_v40  ;;  %v549_v27 = vpack.c.bf16 %v185_v23, %v177_v22  ;;  %v184_v31 = vld [vmem:[#allocation5 + $0x3d0] sm:$0xff]  ;;  %v67_v32 = vld [vmem:[#allocation5 + $0x28] sm:$0xff]  ;;  %v69_v34 = vld [vmem:[#allocation5 + $0x38] sm:$0xff]  ;;  %v519_v36 = vpack.c.bf16 %v182_v29, %v174_v28 }
  0x3d   :  { %534 = vmatprep.subr.bf16.mxu1 %v533_v41  ;;  %v75_v33 = vld [vmem:[#allocation5 + $0x68] sm:$0xff]  ;;  %v77_v35 = vld [vmem:[#allocation5 + $0x78] sm:$0xff]  ;;  %v551_v37 = vpack.c.bf16 %v184_v31, %v176_v30  ;;  %v66_v40 = vld [vmem:[#allocation5 + $0x20] sm:$0xff] }
  0x3e   :  { %v553_v38 = vpack.c.bf16 %v75_v33, %v67_v32  ;;  %v585_v39 = vpack.c.bf16 %v77_v35, %v69_v34  ;;  %v74_v41 = vld [vmem:[#allocation5 + $0x60] sm:$0xff]  ;;  %v68_v42 = vld [vmem:[#allocation5 + $0x30] sm:$0xff]  ;;  %v83_v44 = vld [vmem:[#allocation5 + $0xa8] sm:$0xff] }
  0x3f   :  { %v76_v43 = vld [vmem:[#allocation5 + $0x70] sm:$0xff]  ;;  %v91_v45 = vld [vmem:[#allocation5 + $0xe8] sm:$0xff]  ;;  %v85_v46 = vld [vmem:[#allocation5 + $0xb8] sm:$0xff]  ;;  %v555_v49 = vpack.c.bf16 %v74_v41, %v66_v40 }
  0x40   :  { %v93_v47 = vld [vmem:[#allocation5 + $0xf8] sm:$0xff]  ;;  %v54_v48 = vld [vmem:[#allocation2] sm:$0xff]  ;;  %v56_v50 = vld [vmem:[#allocation2 + $0x10] sm:$0xff]  ;;  %v587_v51 = vpack.c.bf16 %v76_v43, %v68_v42 }
  0x41   :  { %v82_v56 = vld [vmem:[#allocation5 + $0xa0] sm:$0xff]  ;;  %v84_v58 = vld [vmem:[#allocation5 + $0xb0] sm:$0xff]  ;;  %v99_v60 = vld [vmem:[#allocation5 + $0x128] sm:$0xff] }
  0x42   :  { %v90_v57 = vld [vmem:[#allocation5 + $0xe0] sm:$0xff]  ;;  %v92_v59 = vld [vmem:[#allocation5 + $0xf0] sm:$0xff]  ;;  %v107_v61 = vld [vmem:[#allocation5 + $0x168] sm:$0xff] }
  0x43   :  { %504 = vmatpush1.bf16.xpose.msra.mxu0 %v503_v52  ;;  %v557_v52 = vpack.c.bf16 %v91_v45, %v83_v44  ;;  %v101_v62 = vld [vmem:[#allocation5 + $0x138] sm:$0xff]  ;;  %v98_v4 = vld [vmem:[#allocation5 + $0x120] sm:$0xff]  ;;  %v100_v6 = vld [vmem:[#allocation5 + $0x130] sm:$0xff] }
  0x44   :  { %536 = vmatpush1.bf16.xpose.msra.mxu1 %v535_v53  ;;  %506 = vmatprep.subr.bf16.mxu0 %v505_v54  ;;  %v589_v53 = vpack.c.bf16 %v93_v47, %v85_v46  ;;  %v59_v54 = vld [vmem:[#allocation2 + $0x28] sm:$0xff]  ;;  %v109_v63 = vld [vmem:[#allocation5 + $0x178] sm:$0xff]  ;;  %v106_v5 = vld [vmem:[#allocation5 + $0x160] sm:$0xff] }
  0x45   :  { %538 = vmatprep.subr.bf16.mxu1 %v537_v55  ;;  %v61_v55 = vld [vmem:[#allocation2 + $0x38] sm:$0xff]  ;;  %v108_v7 = vld [vmem:[#allocation5 + $0x170] sm:$0xff]  ;;  %v115_v8 = vld [vmem:[#allocation5 + $0x1a8] sm:$0xff] }
  0x46   :  { %v123_v9 = vld [vmem:[#allocation5 + $0x1e8] sm:$0xff]  ;;  %v117_v10 = vld [vmem:[#allocation5 + $0x1b8] sm:$0xff]  ;;  %v114_v16 = vld [vmem:[#allocation5 + $0x1a0] sm:$0xff] }
  0x47   :  { %v125_v11 = vld [vmem:[#allocation5 + $0x1f8] sm:$0xff]  ;;  %v122_v17 = vld [vmem:[#allocation5 + $0x1e0] sm:$0xff]  ;;  %v116_v18 = vld [vmem:[#allocation5 + $0x1b0] sm:$0xff] }
  0x48   :  { %v124_v19 = vld [vmem:[#allocation5 + $0x1f0] sm:$0xff]  ;;  %v131_v20 = vld [vmem:[#allocation5 + $0x228] sm:$0xff]  ;;  %v133_v22 = vld [vmem:[#allocation5 + $0x238] sm:$0xff] }
  0x49   :  { %v139_v21 = vld [vmem:[#allocation5 + $0x268] sm:$0xff]  ;;  %v141_v23 = vld [vmem:[#allocation5 + $0x278] sm:$0xff]  ;;  %v130_v28 = vld [vmem:[#allocation5 + $0x220] sm:$0xff] }
  0x4a   :  { %v138_v29 = vld [vmem:[#allocation5 + $0x260] sm:$0xff]  ;;  %v132_v30 = vld [vmem:[#allocation5 + $0x230] sm:$0xff]  ;;  %v147_v32 = vld [vmem:[#allocation5 + $0x2a8] sm:$0xff] }
  0x4b   :  { %508 = vmatpush1.bf16.xpose.msra.mxu0 %v507_v0  ;;  %v559_v0 = vpack.c.bf16 %v90_v57, %v82_v56  ;;  %v140_v31 = vld [vmem:[#allocation5 + $0x270] sm:$0xff]  ;;  %v155_v33 = vld [vmem:[#allocation5 + $0x2e8] sm:$0xff]  ;;  %v149_v34 = vld [vmem:[#allocation5 + $0x2b8] sm:$0xff] }
  0x4c   :  { %540 = vmatpush1.bf16.xpose.msra.mxu1 %v539_v1  ;;  %510 = vmatprep.subr.bf16.mxu0 %v509_v2  ;;  %v591_v1 = vpack.c.bf16 %v92_v59, %v84_v58  ;;  %v561_v2 = vpack.c.bf16 %v107_v61, %v99_v60  ;;  %v157_v35 = vld [vmem:[#allocation5 + $0x2f8] sm:$0xff]  ;;  %v146_v40 = vld [vmem:[#allocation5 + $0x2a0] sm:$0xff]  ;;  %v148_v42 = vld [vmem:[#allocation5 + $0x2b0] sm:$0xff] }
  0x4d   :  { %542 = vmatprep.subr.bf16.mxu1 %v541_v3  ;;  %v593_v3 = vpack.c.bf16 %v109_v63, %v101_v62  ;;  %v154_v41 = vld [vmem:[#allocation5 + $0x2e0] sm:$0xff]  ;;  %v156_v43 = vld [vmem:[#allocation5 + $0x2f0] sm:$0xff]  ;;  %v163_v44 = vld [vmem:[#allocation5 + $0x328] sm:$0xff] }
  0x4e   :  { %v171_v45 = vld [vmem:[#allocation5 + $0x368] sm:$0xff]  ;;  %v165_v46 = vld [vmem:[#allocation5 + $0x338] sm:$0xff] }
  0x4f   :  { %v173_v47 = vld [vmem:[#allocation5 + $0x378] sm:$0xff]  ;;  %v179_v56 = vld [vmem:[#allocation5 + $0x3a8] sm:$0xff] }
  0x50   :  { %v187_v57 = vld [vmem:[#allocation5 + $0x3e8] sm:$0xff]  ;;  %v181_v58 = vld [vmem:[#allocation5 + $0x3b8] sm:$0xff] }
  0x51   :  { %v189_v59 = vld [vmem:[#allocation5 + $0x3f8] sm:$0xff]  ;;  %v581_v62 = vpack.c.bf16 %v187_v57, %v179_v56 }
  0x52   :  { %v613_v63 = vpack.c.bf16 %v189_v59, %v181_v58 }
  0x53   :  { %512 = vmatpush1.bf16.xpose.msra.mxu0 %v511_v12  ;;  %v563_v12 = vpack.c.bf16 %v106_v5, %v98_v4 }
  0x54   :  { %544 = vmatpush1.bf16.xpose.msra.mxu1 %v543_v13  ;;  %514 = vmatprep.subr.bf16.mxu0 %v513_v14  ;;  %v595_v13 = vpack.c.bf16 %v108_v7, %v100_v6  ;;  %v565_v14 = vpack.c.bf16 %v123_v9, %v115_v8  ;;  %v58_v6 = vld [vmem:[#allocation2 + $0x20] sm:$0xff]  ;;  %v60_v7 = vld [vmem:[#allocation2 + $0x30] sm:$0xff] }
  0x55   :  { %546 = vmatprep.subr.bf16.mxu1 %v545_v15  ;;  %v597_v15 = vpack.c.bf16 %v125_v11, %v117_v10 }
  0x5b   :  { %516 = vmatpush1.bf16.xpose.msra.mxu0 %v515_v24  ;;  %v567_v24 = vpack.c.bf16 %v122_v17, %v114_v16  ;;  %v488_v17 = vld [vmem:[%s767_s2] ss:$0 sm:$0xff] }
  0x5c   :  { %548 = vmatpush1.bf16.xpose.msra.mxu1 %v547_v25  ;;  %518 = vmatprep.subr.bf16.mxu0 %v517_v26  ;;  %v599_v25 = vpack.c.bf16 %v124_v19, %v116_v18  ;;  %v569_v26 = vpack.c.bf16 %v139_v21, %v131_v20 }
  0x5d   :  { %550 = vmatprep.subr.bf16.mxu1 %v549_v27  ;;  %v601_v27 = vpack.c.bf16 %v141_v23, %v133_v22 }
  0x63   :  { %520 = vmatpush1.bf16.xpose.msra.mxu0 %v519_v36  ;;  %v571_v36 = vpack.c.bf16 %v138_v29, %v130_v28 }
  0x64   :  { %552 = vmatpush1.bf16.xpose.msra.mxu1 %v551_v37  ;;  %554 = vmatprep.subr.bf16.mxu0 %v553_v38  ;;  %v603_v37 = vpack.c.bf16 %v140_v31, %v132_v30  ;;  %v573_v38 = vpack.c.bf16 %v155_v33, %v147_v32 }
  0x65   :  { %586 = vmatprep.subr.bf16.mxu1 %v585_v39  ;;  %v605_v39 = vpack.c.bf16 %v157_v35, %v149_v34 }
  0x6a   :  { %255 = vmatmul.mubr.f32.vlgmr.msra.gmra.mrb[0].mxu0 %v54_v48  ;;  %v575_v48 = vpack.c.bf16 %v154_v41, %v146_v40 }
  0x6b   :  { %325 = vmatmul.mubr.f32.vlgmr.msra.gmra.mrb[0].mxu1 %v56_v50  ;;  %556 = vmatpush1.bf16.xpose.msra.mxu0 %v555_v49  ;;  %v607_v49 = vpack.c.bf16 %v156_v43, %v148_v42  ;;  %v577_v50 = vpack.c.bf16 %v171_v45, %v163_v44 }
  0x6c   :  { %588 = vmatpush1.bf16.xpose.msra.mxu1 %v587_v51  ;;  %558 = vmatprep.subr.bf16.mxu0 %v557_v52  ;;  %v609_v51 = vpack.c.bf16 %v173_v47, %v165_v46  ;;  %v162_v52 = vld [vmem:[#allocation5 + $0x320] sm:$0xff] }
  0x6d   :  { %590 = vmatprep.subr.bf16.mxu1 %v589_v53  ;;  %394 = vmatprep.mubr.f32.mxu0 %v59_v54  ;;  %v170_v53 = vld [vmem:[#allocation5 + $0x360] sm:$0xff]  ;;  %v164_v54 = vld [vmem:[#allocation5 + $0x330] sm:$0xff] }
  0x6e   :  { %464 = vmatprep.mubr.f32.mxu1 %v61_v55  ;;  %v172_v55 = vld [vmem:[#allocation5 + $0x370] sm:$0xff]  ;;  %v579_v60 = vpack.c.bf16 %v170_v53, %v162_v52 }
  0x6f   :  { %v611_v61 = vpack.c.bf16 %v172_v55, %v164_v54 }
  0x73   :  { %560 = vmatpush1.bf16.xpose.msra.mxu0 %v559_v0  ;;  %v178_v0 = vld [vmem:[#allocation5 + $0x3a0] sm:$0xff] }
  0x74   :  { %592 = vmatpush1.bf16.xpose.msra.mxu1 %v591_v1  ;;  %562 = vmatprep.subr.bf16.mxu0 %v561_v2  ;;  %v186_v1 = vld [vmem:[#allocation5 + $0x3e0] sm:$0xff]  ;;  %v180_v2 = vld [vmem:[#allocation5 + $0x3b0] sm:$0xff] }
  0x75   :  { %594 = vmatprep.subr.bf16.mxu1 %v593_v3  ;;  %v188_v3 = vld [vmem:[#allocation5 + $0x3f0] sm:$0xff]  ;;  %v583_v4 = vpack.c.bf16 %v186_v1, %v178_v0 }
  0x76   :  { %v615_v5 = vpack.c.bf16 %v188_v3, %v180_v2 }
  0x7b   :  { %564 = vmatpush1.bf16.xpose.msra.mxu0 %v563_v12 }
  0x7c   :  { %596 = vmatpush1.bf16.xpose.msra.mxu1 %v595_v13  ;;  %566 = vmatprep.subr.bf16.mxu0 %v565_v14 }
  0x7d   :  { %598 = vmatprep.subr.bf16.mxu1 %v597_v15 }
  0x83   :  { %568 = vmatpush1.bf16.xpose.msra.mxu0 %v567_v24 }
  0x84   :  { %600 = vmatpush1.bf16.xpose.msra.mxu1 %v599_v25  ;;  %570 = vmatprep.subr.bf16.mxu0 %v569_v26 }
  0x85   :  { %602 = vmatprep.subr.bf16.mxu1 %v601_v27 }
  0x8b   :  { %572 = vmatpush1.bf16.xpose.msra.mxu0 %v571_v36 }
  0x8c   :  { %604 = vmatpush1.bf16.xpose.msra.mxu1 %v603_v37  ;;  %574 = vmatprep.subr.bf16.mxu0 %v573_v38 }
  0x8d   :  { %606 = vmatprep.subr.bf16.mxu1 %v605_v39 }
  0x93   :  { %576 = vmatpush1.bf16.xpose.msra.mxu0 %v575_v48 }
  0x94   :  { %608 = vmatpush1.bf16.xpose.msra.mxu1 %v607_v49  ;;  %578 = vmatprep.subr.bf16.mxu0 %v577_v50 }
  0x95   :  { %610 = vmatprep.subr.bf16.mxu1 %v609_v51 }
  0x9b   :  { %580 = vmatpush1.bf16.xpose.msra.mxu0 %v579_v60 }
  0x9c   :  { %612 = vmatpush1.bf16.xpose.msra.mxu1 %v611_v61  ;;  %582 = vmatprep.subr.bf16.mxu0 %v581_v62 }
  0x9d   :  { %614 = vmatprep.subr.bf16.mxu1 %v613_v63 }
  0xa3   :  { %584 = vmatpush1.bf16.xpose.msra.mxu0 %v583_v4 }
  0xa4   :  { %616 = vmatpush1.bf16.xpose.msra.mxu1 %v615_v5 }
  0xaa   :  { %395 = vmatmul.mubr.f32.vlgmr.msra.gmra.mrb[2].mxu0 %v58_v6 }
  0xab   :  { %465 = vmatmul.mubr.f32.vlgmr.msra.gmra.mrb[2].mxu1 %v60_v7 }
 0x13d   :  { %v256_v8 = vpop.f32.mrb[0].mxu0 }
 0x13e   :  { %v258_v9 = vpop.f32.mrb[1].mxu0  ;;  %v326_v10 = vpop.f32.mrb[0].mxu1 }
 0x13f   :  { %v327_v11 = vadd.f32 %v326_v10, %v256_v8  ;;  %v328_v12 = vpop.f32.mrb[1].mxu1 }
 0x17d   :  { %v396_v13 = vpop.f32.mrb[2].mxu0 }
 0x17e   :  { %v397_v14 = vadd.f32 %v396_v13, %v327_v11  ;;  %v398_v15 = vpop.f32.mrb[3].mxu0  ;;  %v466_v16 = vpop.f32.mrb[2].mxu1 }
 0x17f   :  { %v468_v18 = vpop.f32.mrb[3].mxu1 }
 0x180   :  { %v467_v19 = vadd.f32 %v466_v16, %v397_v14 }
 0x182   :  { %v470_v20 = vadd.f32 %v488_v17, %v467_v19 }
 0x184   :  { %471 = vst [vmem:[#allocation7] sm:$0xff] %v470_v20 }
 0x185   :  { %677 = shalt.err (!%p674_p6)
}
 0x186   :  { %s678_s16 = scalar_lea.hbm %s768_s3, 128 }
 0x187   :  { %p679_p7 = scmp.ne.s32.totalorder %s768_s3, %s678_s16  ;;  %p682_p8 = scmp.lt.u32.totalorder %s678_s16, %s768_s3 }
 0x189   :  { %p684_p9 = pnand %p682_p8, %p679_p7 }
 0x18b   :  { %687 = shalt.err (!%p684_p9)
}
 0x18c   :  { %481 = dma.vmem_to_hbm [thread:$0]  %s479_s12, 128, %s768_s3, [#allocation4]  }
 0x18d   :  { %692 = dma.done.wait [#allocation4], 128  }
 0x18e   :  { %693 = vsyncadd [#allocation4], 4294967168 }
 0x18f   :  { %485 = vsyncpa [#allocation3], 1 }
 0x190   :  { %486 = vsyncpa [#allocation6], 1 }
 0x191   :  { %487 = vsyncpa [#allocation4], 1 }

</bundles_post_ra>
